<compile_context>
chip_gen: v6e
topology: v6e:2x2x1
jax: 0.10.0
libtpu: 0.0.40
codegen_flags: <defaults>
</compile_context>

<pallas_src>
import jax
import jax.numpy as jnp
from jax.experimental import pallas as pl
from jax.experimental.pallas import tpu as pltpu  # noqa: F401  (TPU backend)

_LANES = 128  # TPU vreg lane width; last dim of the slab is always 128.


def _sublane_pack(dtype) -> int:
    """Sublane packing factor: 8 for 32-bit, 16 for 16-bit, 32 for 8-bit."""
    itemsize = jnp.dtype(dtype).itemsize
    if itemsize >= 4:
        return 8
    if itemsize == 2:
        return 16
    return 32


def _copy_kernel(x_ref, o_ref):
    # Pure pass-through: the reference forward has no tensor compute at all.
    o_ref[...] = x_ref[...]


def _identity_pallas(x):
    """Round-trip x through a single-block, lane-dense Pallas copy kernel.

    Used only to validate the Pallas toolchain in __main__; the model forward
    itself does no device work (matching the PyTorch reference).
    """
    orig_shape = x.shape
    orig_dtype = x.dtype
    n = x.size

    pack = _sublane_pack(orig_dtype)
    tile = pack * _LANES  # one fully packed vreg worth of elements
    n_padded = ((n + tile - 1) // tile) * tile

    flat = x.reshape(-1)
    if n_padded != n:
        # Pad up to a whole packed-vreg multiple so every store is a full,
        # unmasked vst on lane-dense, fully-occupied sublanes.
        flat = jnp.pad(flat, (0, n_padded - n))

    slab = flat.reshape(n_padded // _LANES, _LANES)

    out = pl.pallas_call(
        _copy_kernel,
        out_shape=jax.ShapeDtypeStruct(slab.shape, slab.dtype),
        # Single whole-array VMEM block, no grid: the tensor is tiny (8 KiB),
        # so per-step pipelining would be pure overhead.
    )(slab)

    out_flat = out.reshape(-1)
    if n_padded != n:
        out_flat = out_flat[:n]
    return out_flat.reshape(orig_shape)


class ResNet16:
    """JAX/Pallas port of the (empty) PyTorch ResNet16 module."""

    def __init__(self):
        # The PyTorch __init__ defines no parameters; nothing to initialize.
        pass

    def forward(self, x):
        # The reference forward performs no tensor math and returns the
        # Python string ''.  No Pallas launch / device work happens here —
        # forward is O(1) Python, exactly like the PyTorch module.
        # TODO(synk): module is named ResNet16 but defines no conv/residual
        # layers in the reference; there is nothing to translate.
        output = ''
        return output

    __call__ = forward


if __name__ == "__main__":
    key = jax.random.PRNGKey(0)
    # Small NCHW input consistent with a conv-style module: batch=2, C=4, 16x16.
    x = jax.random.normal(key, (2, 4, 16, 16), dtype=jnp.float32)

    model = ResNet16()
    out = model(x)
    # Forward must return the empty string, exactly like the PyTorch reference.
    assert out == ''

    # Exercise the Pallas path once (outside forward) and check the round-trip.
    y = jax.block_until_ready(_identity_pallas(x))
    assert y.shape == x.shape and y.dtype == x.dtype
    assert jnp.array_equal(y, x)

    print("KERNEL_OK")
</pallas_src>

<mosaic_0001>
module attributes {stable_mosaic.version = 11 : i64} {
  func.func @_copy_kernel(%arg0: memref<16x128xf32, #tpu.memory_space<vmem>>, %arg1: memref<16x128xf32, #tpu.memory_space<vmem>>) attributes {dimension_semantics = [], scalar_prefetch = 0 : i64, scratch_operands = 0 : i64, tpu.core_type = #tpu.core_type<tc>} {
    %c0 = arith.constant 0 : index
    %c0_0 = arith.constant 0 : index
    %0 = vector.load %arg0[%c0, %c0_0] : memref<16x128xf32, #tpu.memory_space<vmem>>, vector<16x128xf32>
    %c0_1 = arith.constant 0 : index
    %c0_2 = arith.constant 0 : index
    %1 = vector.load %arg1[%c0_1, %c0_2] : memref<16x128xf32, #tpu.memory_space<vmem>>, vector<16x128xf32>
    tpu.vector_store %arg1[%c0_1, %c0_2], %0 {strides = array<i32>} : memref<16x128xf32, #tpu.memory_space<vmem>>, vector<16x128xf32>,
    return
  }
}

</mosaic_0001>

<bundles_post_ra>
// kernel: tpu_custom_call.1
= control target key start
LH: loop header
LB: loop body
LE: loop exit
PB: predicated region body
PF: predicated region fallthrough
CT: control target
= control target key end

     0   :  { %6 = vsyncpa [#allocation3], 0  ;;  %s112_s0 = inlined_call_operand.hbm [shape: f32[16,128], index: 0, kind: input, shape index: {}]   ;;  %s113_s1 = inlined_call_operand.hbm [shape: f32[16,128], index: 1, kind: output, shape index: {}]  }
   0x1   :  { %7 = vsyncpa [#allocation4], 0  ;;  %s92_s6 = smov [#allocation2]  }
   0x2   :  { %s13_s7 = sshll.u32 %s92_s6, 4  ;;  %s14_s7 = int_to_ptr.vmem [resolvable:$true] %s13_s7 }
   0x3   :  { %s56_s8 = scalar_lea.vmem %s14_s7, 256  ;;  %p61_p1 = scmp.lt.s32.totalorder %s14_s7, %s14_s7 }
   0x4   :  { %p57_p0 = scmp.ne.s32.totalorder %s14_s7, %s56_s8  ;;  %p62_p2 = scmp.lt.s32.totalorder %s56_s8, %s56_s8 }
   0x6   :  { %p63_p3 = por %p62_p2, %p61_p1 }
   0x8   :  { %p64_p4 = pnand %p63_p3, %p57_p0 }
   0xa   :  { %67 = shalt.err (!%p64_p4)
}
   0xb   :  { %s93_s9 = smov 128   ;;  %s94_s10 = smov 8  }
   0xc   :  { %19 = dma.hbm_to_vmem [thread:$0]  %s112_s0, 256, %s14_s7, [#allocation3], %s93_s9, %s93_s9, %s94_s10  }
   0xd   :  { %88 = dma.done.wait [#allocation3], 256  }
   0xe   :  { %89 = vsyncadd [#allocation3], 4294967040  ;;  %s95_s13 = smov [#allocation5]   ;;  %v23_v0 = vld [vmem:[#allocation2] sm:$0xff]  ;;  %v24_v1 = vld [vmem:[#allocation2 + $0x8] sm:$0xff] }
   0xf   :  { %s32_s14 = sshll.u32 %s95_s13, 4  ;;  %25 = vst [vmem:[#allocation5] sm:$0xff] %v23_v0  ;;  %26 = vst [vmem:[#allocation5 + $0x8] sm:$0xff] %v24_v1  ;;  %s33_s14 = int_to_ptr.vmem [resolvable:$true] %s32_s14 }
  0x10   :  { %s68_s15 = scalar_lea.vmem %s33_s14, 256  ;;  %p73_p6 = scmp.lt.s32.totalorder %s33_s14, %s33_s14 }
  0x11   :  { %p69_p5 = scmp.ne.s32.totalorder %s33_s14, %s68_s15  ;;  %p74_p7 = scmp.lt.s32.totalorder %s68_s15, %s68_s15 }
  0x13   :  { %p75_p8 = por %p74_p7, %p73_p6 }
  0x15   :  { %p76_p9 = pnand %p75_p8, %p69_p5 }
  0x17   :  { %79 = shalt.err (!%p76_p9)
}
  0x18   :  { %38 = dma.vmem_to_hbm [thread:$0]  %s33_s14, 256, %s113_s1, [#allocation4], %s93_s9, %s93_s9, %s94_s10  }
  0x19   :  { %90 = dma.done.wait [#allocation4], 256  }
  0x1a   :  { %91 = vsyncadd [#allocation4], 4294967040 }
  0x1b   :  { %42 = vsyncpa [#allocation3], 1 }
  0x1c   :  { %43 = vsyncpa [#allocation4], 1 }

</bundles_post_ra>
